<compile_context>
chip_gen: v7x
topology: tpu7x:2x2x1
jax: 0.10.0
libtpu: 0.0.40
codegen_flags: <defaults>
</compile_context>

<pallas_src>
import functools

import jax
import jax.numpy as jnp
from jax import lax
from jax.experimental import pallas as pl
from jax.experimental.pallas import tpu as pltpu

# ---- small, module-consistent shapes -------------------------------------
IMG_H = 16
IMG_W = 16
CHANS = 3
PATCH = 4
GRID_H = IMG_H // PATCH
GRID_W = IMG_W // PATCH
N_TOKENS = GRID_H * GRID_W            # 16 tokens (ViT-style patch tokens)
PATCH_DIM = CHANS * PATCH * PATCH     # 48
FEAT_DIM = 32                         # synthetic "hidden" dim of the backbone
N_EIG = 5                             # n_eigenvectors
LAMBDA_COLOR = 10.0                   # lambda_color

_VMEM_SPEC = pl.BlockSpec(memory_space=pltpu.MemorySpace.VMEM)


# ---- kernel 1 (fused): embedding + affinities + normalized Laplacian ------
def _spectral_kernel(patches_ref, w_ref, b_ref, cnc_ref, ccn_ref, lap_ref, *,
                     lam):
    # Deep features: normalization is pre-folded into (w', bias), so this is a
    # single MXU matmul plus a VPU bias add on the *raw* patches.
    feats = jnp.dot(patches_ref[...], w_ref[...],
                    preferred_element_type=jnp.float32) + b_ref[...]   # [N, D]
    inv_norm = lax.rsqrt(jnp.sum(feats * feats, axis=-1, keepdims=True) + 1e-8)
    fn = feats * inv_norm

    # Feature affinity: relu(cosine similarity).  dot_general contracts the
    # last dims of both operands ("trans-B") -> no explicit XLU transpose.
    w_feat = lax.dot_general(fn, fn,
                             dimension_numbers=(((1,), (1,)), ((), ())),
                             preferred_element_type=jnp.float32)       # [N, N]
    w_feat = jnp.maximum(w_feat, 0.0)

    # Color affinity: exp(-||c_i - c_j||^2) computed purely on the VPU with
    # per-channel broadcasts (no K=3 MXU Gram matmul, no transpose).
    cnc = cnc_ref[...]            # [N, C] -> per-channel column views
    ccn = ccn_ref[...]            # [C, N] -> per-channel row views
    d2 = None
    for ch in range(CHANS):       # static, unrolled (3 sub/mul/add triples)
        diff = cnc[:, ch:ch + 1] - ccn[ch:ch + 1, :]                   # [N, N]
        sq = diff * diff
        d2 = sq if d2 is None else d2 + sq
    w_color = jnp.exp(-d2)

    w = w_feat + lam * w_color    # lam is a compile-time Python constant

    # Normalized Laplacian  L = I - D^{-1/2} W D^{-1/2}
    # (W is symmetric, so the column-degree equals the row-degree; computing
    #  both reductions avoids an explicit [N,1] -> [1,N] transpose.)
    dinv_r = lax.rsqrt(jnp.sum(w, axis=-1, keepdims=True) + 1e-8)      # [N, 1]
    dinv_c = lax.rsqrt(jnp.sum(w, axis=0, keepdims=True) + 1e-8)       # [1, N]
    n = w.shape[0]
    rows = lax.broadcasted_iota(jnp.int32, (n, n), 0)
    cols = lax.broadcasted_iota(jnp.int32, (n, n), 1)
    eye = (rows == cols).astype(jnp.float32)
    lap_ref[...] = eye - dinv_r * w * dinv_c


def build_laplacian(patches_raw, w_prime, bias, colors_nc, colors_cn,
                    lambda_color):
    kernel = functools.partial(_spectral_kernel, lam=float(lambda_color))
    return pl.pallas_call(
        kernel,
        out_shape=jax.ShapeDtypeStruct((N_TOKENS, N_TOKENS), jnp.float32),
        in_specs=[_VMEM_SPEC] * 5,
        out_specs=_VMEM_SPEC,
    )(patches_raw, w_prime, bias, colors_nc, colors_cn)


# ---- kernel 2: eigenvector -> binary mask at token resolution --------------
def _mask_kernel(ev_ref, mask_ref):
    x = ev_ref[...]                                    # [n_eig, N_TOKENS]
    m = jnp.mean(x, axis=-1, keepdims=True)
    mask_ref[...] = (x > m).astype(jnp.int32)          # np.where(m > m.mean(),1,0)


def masks_from_eigvecs(ev_tok):
    n, t = ev_tok.shape
    return pl.pallas_call(
        _mask_kernel,
        out_shape=jax.ShapeDtypeStruct((n, t), jnp.int32),
        in_specs=[_VMEM_SPEC],
        out_specs=_VMEM_SPEC,
    )(ev_tok)


# ---- full forward pass (wrapper) ------------------------------------------
def deep_spectral_methods(img_hwc, w_embed,
                          n_eigenvectors=N_EIG, lambda_color=LAMBDA_COLOR):
    h, w, c = img_hwc.shape

    # ToTensor + Normalize folded into the embedding weight/bias (host-side,
    # tiny constants): (x - mean)/std @ W  ==  x @ W' + b'
    mean = jnp.array([0.485, 0.456, 0.406], jnp.float32)
    inv_std = 1.0 / jnp.array([0.229, 0.224, 0.225], jnp.float32)
    mean_cols = jnp.repeat(mean, PATCH * PATCH)          # [48], channel-major
    inv_std_cols = jnp.repeat(inv_std, PATCH * PATCH)    # [48]
    w_prime = w_embed * inv_std_cols[:, None]            # [48, 32]
    bias = (-(mean_cols * inv_std_cols) @ w_embed).reshape(1, FEAT_DIM)

    # Patchify the raw image (pure layout glue; no pallas_call needed).
    img_chw = jnp.transpose(img_hwc, (2, 0, 1)).astype(jnp.float32)
    p5 = img_chw.reshape(c, GRID_H, PATCH, GRID_W, PATCH)
    p5 = jnp.transpose(p5, (1, 3, 0, 2, 4))              # [gh, gw, C, p, p]
    patches_raw = p5.reshape(N_TOKENS, PATCH_DIM)        # [N, C*p*p]

    # Per-patch mean colors of the *normalized* image (affine commutes with
    # the mean), provided in both [N,C] and [C,N] layouts so the kernel can
    # broadcast per-channel rows/columns without any in-kernel transpose.
    raw_colors = jnp.mean(p5.reshape(N_TOKENS, c, PATCH * PATCH), axis=-1)
    colors_nc = (raw_colors - mean[None, :]) * inv_std[None, :]   # [N, C]
    colors_cn = colors_nc.T                                       # [C, N]

    # Fused Pallas kernel: features + affinity + normalized Laplacian.
    lap = build_laplacian(patches_raw, w_prime, bias, colors_nc, colors_cn,
                          lambda_color)

    # TODO(synk): eigendecomposition has no Pallas lowering; done in plain JAX.
    _, eigvecs = jnp.linalg.eigh(lap)
    ev_tok = eigvecs[:, 1:1 + n_eigenvectors].T          # skip trivial eigvec

    # Threshold at token resolution (Pallas kernel).  Thresholding against the
    # mean commutes with uniform nearest-neighbour replication, so this is
    # equivalent to thresholding after the cv2.INTER_NEAREST resize.
    mask_tok = masks_from_eigvecs(ev_tok)                # [n_eig, N_TOKENS]
    areas = jnp.sum(mask_tok, axis=-1) * (PATCH * PATCH)

    # Nearest-neighbour upsample of the tiny int mask back to image resolution.
    m = mask_tok.reshape(n_eigenvectors, GRID_H, GRID_W).astype(jnp.uint8)
    masks_full = jnp.repeat(jnp.repeat(m, PATCH, axis=1), PATCH, axis=2)

    # TODO(synk): Otsu thresholding and connectedComponentsWithStats ("clean")
    #             have no Pallas/TPU equivalent and are omitted.
    return masks_full, areas


if __name__ == "__main__":
    key = jax.random.PRNGKey(0)
    k_img, k_w = jax.random.split(key)
    # deterministic synthetic image (HWC, [0,1]) and patch-embedding weight
    img = jax.random.uniform(k_img, (IMG_H, IMG_W, CHANS), jnp.float32)
    w_embed = (jax.random.normal(k_w, (PATCH_DIM, FEAT_DIM), jnp.float32)
               / jnp.sqrt(PATCH_DIM))

    masks, areas = deep_spectral_methods(img, w_embed)
    masks = jax.block_until_ready(masks)
    areas = jax.block_until_ready(areas)

    # sort masks by area, descending (mirrors the python-side sort in forward);
    # pull areas to host once to avoid per-element device syncs.
    areas_host = jax.device_get(areas)
    order = sorted(range(int(areas_host.shape[0])),
                   key=lambda i: int(areas_host[i]), reverse=True)
    results = [{"segmentation": masks[i], "area": int(areas_host[i])}
               for i in order]
    assert len(results) == N_EIG
    assert results[0]["segmentation"].shape == (IMG_H, IMG_W)
    assert all(results[i]["area"] >= results[i + 1]["area"]
               for i in range(len(results) - 1))

    print("KERNEL_OK")
</pallas_src>

<mosaic_0001>
module attributes {stable_mosaic.version = 11 : i64} {
  func.func @_spectral_kernel(%arg0: memref<16x48xf32, #tpu.memory_space<vmem>>, %arg1: memref<48x32xf32, #tpu.memory_space<vmem>>, %arg2: memref<1x32xf32, #tpu.memory_space<vmem>>, %arg3: memref<16x3xf32, #tpu.memory_space<vmem>>, %arg4: memref<3x16xf32, #tpu.memory_space<vmem>>, %arg5: memref<16x16xf32, #tpu.memory_space<vmem>>) attributes {dimension_semantics = [], scalar_prefetch = 0 : i64, scratch_operands = 0 : i64, tpu.core_type = #tpu.core_type<tc>} {
    %c0 = arith.constant 0 : index
    %c0_0 = arith.constant 0 : index
    %0 = vector.load %arg0[%c0, %c0_0] : memref<16x48xf32, #tpu.memory_space<vmem>>, vector<16x48xf32>
    %c0_1 = arith.constant 0 : index
    %c0_2 = arith.constant 0 : index
    %1 = vector.load %arg1[%c0_1, %c0_2] : memref<48x32xf32, #tpu.memory_space<vmem>>, vector<48x32xf32>
    %cst = arith.constant dense<0.000000e+00> : vector<16x32xf32>
    %2 = tpu.matmul %0, %1, %cst {dimension_numbers = #tpu.dot_dimension_numbers<[1], [0], [0], [1], [0, 0, 1, 1], [], []>} : vector<16x48xf32>, vector<48x32xf32>, vector<16x32xf32> -> vector<16x32xf32>
    %c0_3 = arith.constant 0 : index
    %c0_4 = arith.constant 0 : index
    %3 = vector.load %arg2[%c0_3, %c0_4] : memref<1x32xf32, #tpu.memory_space<vmem>>, vector<1x32xf32>
    %4 = vector.broadcast %3 : vector<1x32xf32> to vector<16x32xf32>
    %5 = arith.addf %2, %4 : vector<16x32xf32>
    %6 = arith.mulf %5, %5 : vector<16x32xf32>
    %cst_5 = arith.constant dense<0.000000e+00> : vector<16xf32>
    %7 = vector.multi_reduction <add>, %6, %cst_5 [1] : vector<16x32xf32> to vector<16xf32>
    %8 = vector.shape_cast %7 : vector<16xf32> to vector<16x1xf32>
    %cst_6 = arith.constant 9.99999993E-9 : f32
    %9 = vector.broadcast %cst_6 : f32 to vector<16x1xf32>
    %10 = arith.addf %8, %9 : vector<16x1xf32>
    %11 = math.rsqrt %10 : vector<16x1xf32>
    %12 = vector.broadcast %11 : vector<16x1xf32> to vector<16x32xf32>
    %13 = arith.mulf %5, %12 : vector<16x32xf32>
    %cst_7 = arith.constant dense<0.000000e+00> : vector<16x16xf32>
    %14 = tpu.matmul %13, %13, %cst_7 {dimension_numbers = #tpu.dot_dimension_numbers<[1], [1], [0], [0], [0, 0, 1, 0], [], []>} : vector<16x32xf32>, vector<16x32xf32>, vector<16x16xf32> -> vector<16x16xf32>
    %cst_8 = arith.constant 0.000000e+00 : f32
    %15 = vector.broadcast %cst_8 : f32 to vector<16x16xf32>
    %16 = arith.maximumf %14, %15 : vector<16x16xf32>
    %c0_9 = arith.constant 0 : index
    %c0_10 = arith.constant 0 : index
    %17 = vector.load %arg3[%c0_9, %c0_10] : memref<16x3xf32, #tpu.memory_space<vmem>>, vector<16x3xf32>
    %c0_11 = arith.constant 0 : index
    %c0_12 = arith.constant 0 : index
    %18 = vector.load %arg4[%c0_11, %c0_12] : memref<3x16xf32, #tpu.memory_space<vmem>>, vector<3x16xf32>
    %19 = vector.extract_strided_slice %17 {offsets = [0, 0], sizes = [16, 1], strides = [1, 1]} : vector<16x3xf32> to vector<16x1xf32>
    %20 = vector.extract_strided_slice %18 {offsets = [0, 0], sizes = [1, 16], strides = [1, 1]} : vector<3x16xf32> to vector<1x16xf32>
    %21 = vector.broadcast %19 : vector<16x1xf32> to vector<16x16xf32>
    %22 = vector.broadcast %20 : vector<1x16xf32> to vector<16x16xf32>
    %23 = arith.subf %21, %22 : vector<16x16xf32>
    %24 = arith.mulf %23, %23 : vector<16x16xf32>
    %25 = vector.extract_strided_slice %17 {offsets = [0, 1], sizes = [16, 1], strides = [1, 1]} : vector<16x3xf32> to vector<16x1xf32>
    %26 = vector.extract_strided_slice %18 {offsets = [1, 0], sizes = [1, 16], strides = [1, 1]} : vector<3x16xf32> to vector<1x16xf32>
    %27 = vector.broadcast %25 : vector<16x1xf32> to vector<16x16xf32>
    %28 = vector.broadcast %26 : vector<1x16xf32> to vector<16x16xf32>
    %29 = arith.subf %27, %28 : vector<16x16xf32>
    %30 = arith.mulf %29, %29 : vector<16x16xf32>
    %31 = arith.addf %24, %30 : vector<16x16xf32>
    %32 = vector.extract_strided_slice %17 {offsets = [0, 2], sizes = [16, 1], strides = [1, 1]} : vector<16x3xf32> to vector<16x1xf32>
    %33 = vector.extract_strided_slice %18 {offsets = [2, 0], sizes = [1, 16], strides = [1, 1]} : vector<3x16xf32> to vector<1x16xf32>
    %34 = vector.broadcast %32 : vector<16x1xf32> to vector<16x16xf32>
    %35 = vector.broadcast %33 : vector<1x16xf32> to vector<16x16xf32>
    %36 = arith.subf %34, %35 : vector<16x16xf32>
    %37 = arith.mulf %36, %36 : vector<16x16xf32>
    %38 = arith.addf %31, %37 : vector<16x16xf32>
    %cst_13 = arith.constant 0.000000e+00 : f32
    %39 = vector.broadcast %cst_13 : f32 to vector<16x16xf32>
    %40 = arith.subf %39, %38 : vector<16x16xf32>
    %41 = math.exp %40 : vector<16x16xf32>
    %cst_14 = arith.constant 1.000000e+01 : f32
    %42 = vector.broadcast %cst_14 : f32 to vector<16x16xf32>
    %43 = arith.mulf %42, %41 : vector<16x16xf32>
    %44 = arith.addf %16, %43 : vector<16x16xf32>
    %cst_15 = arith.constant dense<0.000000e+00> : vector<16xf32>
    %45 = vector.multi_reduction <add>, %44, %cst_15 [1] : vector<16x16xf32> to vector<16xf32>
    %46 = vector.shape_cast %45 : vector<16xf32> to vector<16x1xf32>
    %cst_16 = arith.constant 9.99999993E-9 : f32
    %47 = vector.broadcast %cst_16 : f32 to vector<16x1xf32>
    %48 = arith.addf %46, %47 : vector<16x1xf32>
    %49 = math.rsqrt %48 : vector<16x1xf32>
    %cst_17 = arith.constant dense<0.000000e+00> : vector<16xf32>
    %50 = vector.multi_reduction <add>, %44, %cst_17 [0] : vector<16x16xf32> to vector<16xf32>
    %51 = vector.shape_cast %50 : vector<16xf32> to vector<1x16xf32>
    %cst_18 = arith.constant 9.99999993E-9 : f32
    %52 = vector.broadcast %cst_18 : f32 to vector<1x16xf32>
    %53 = arith.addf %51, %52 : vector<1x16xf32>
    %54 = math.rsqrt %53 : vector<1x16xf32>
    %55 = tpu.iota {dimensions = array<i32: 0>} : vector<16x16xi32>
    %56 = tpu.iota {dimensions = array<i32: 1>} : vector<16x16xi32>
    %57 = arith.cmpi eq, %55, %56 : vector<16x16xi32>
    %58 = arith.extui %57 : vector<16x16xi1> to vector<16x16xi32>
    %59 = arith.sitofp %58 : vector<16x16xi32> to vector<16x16xf32>
    %60 = vector.broadcast %49 : vector<16x1xf32> to vector<16x16xf32>
    %61 = arith.mulf %60, %44 : vector<16x16xf32>
    %62 = vector.broadcast %54 : vector<1x16xf32> to vector<16x16xf32>
    %63 = arith.mulf %61, %62 : vector<16x16xf32>
    %64 = arith.subf %59, %63 : vector<16x16xf32>
    %c0_19 = arith.constant 0 : index
    %c0_20 = arith.constant 0 : index
    %65 = vector.load %arg5[%c0_19, %c0_20] : memref<16x16xf32, #tpu.memory_space<vmem>>, vector<16x16xf32>
    tpu.vector_store %arg5[%c0_19, %c0_20], %64 {strides = array<i32>} : memref<16x16xf32, #tpu.memory_space<vmem>>, vector<16x16xf32>,
    return
  }
}

</mosaic_0001>

<bundles_post_ra>
// kernel: tpu_custom_call.1
= control target key start
LH: loop header
LB: loop body
LE: loop exit
PB: predicated region body
PF: predicated region fallthrough
CT: control target
= control target key end

     0   :  { %vm36_vm0 = vcmask 392192   ;;  %s555_s0 = inlined_call_operand.vmem [shape: f32[16,48], index: 0, kind: input, shape index: {}]   ;;  %s556_s1 = inlined_call_operand.vmem [shape: f32[48,32], index: 1, kind: input, shape index: {}]   ;;  %s557_s2 = inlined_call_operand.vmem [shape: f32[1,32], index: 2, kind: input, shape index: {}]   ;;  %s558_s3 = inlined_call_operand.vmem [shape: f32[16,3], index: 3, kind: input, shape index: {}]   ;;  %s559_s4 = inlined_call_operand.vmem [shape: f32[3,16], index: 4, kind: input, shape index: {}]   ;;  %s560_s5 = inlined_call_operand.hbm [shape: f32[16,16], index: 5, kind: output, shape index: {}]  }
   0x1   :  { %v23_v0 = vld [vmem:[%s556_s1] sm:$0xff]  ;;  %v24_v1 = vld [vmem:[%s556_s1 + $0x8] sm:$0xff]  ;;  %v25_v2 = vld [vmem:[%s556_s1 + $0x10] sm:$0xff] }
   0x2   :  { %v381_v3 = vpack.c.bf16 %v24_v1, %v23_v0  ;;  %v26_v4 = vld [vmem:[%s556_s1 + $0x18] sm:$0xff]  ;;  %v27_v5 = vld [vmem:[%s556_s1 + $0x20] sm:$0xff]  ;;  %v28_v7 = vld [vmem:[%s556_s1 + $0x28] sm:$0xff] }
   0x3   :  { %v385_v6 = vpack.c.bf16 %v26_v4, %v25_v2  ;;  %v21_v8 = vld [vmem:[%s555_s0] sm:$0xff] }
   0x4   :  { %10 = vsyncpa [#allocation3], 0  ;;  %382 = vmatprep.subr.bf16.mxu0 %v381_v3  ;;  %371 = vmatprep.mubr.msk.f32.mxu0 %vm36_vm0, %v21_v8  ;;  %v389_v9 = vpack.c.bf16 %v28_v7, %v27_v5  ;;  %v22_v10 = vld [vmem:[%s555_s0 + $0x8] sm:$0xff]  ;;  %v338_v11 = vld [vmem:[%s557_s2] ss:$0 sm:$0xff]  ;;  %vm120_vm1 = vcmask 261120   ;;  %v229_v36 = vlaneseq }
   0x5   :  { %384 = vmatpush3.bf16.msra.mxu0 %v381_v3  ;;  %v216_v20 = vld [vmem:[%s558_s3] sm:$0xff]  ;;  %v449_v21 = vmov 0   ;;  %v450_v22 = vmov 1   ;;  %v217_v23 = vld [vmem:[%s558_s3 + $0x8] sm:$0xff]  ;;  %v451_v24 = vmov 2   ;;  %vm394_vm2 = vmpackc.low %vm120_vm1, %vm120_vm1  ;;  %vm283_vm3 = vcmask 130048  }
   0x6   :  { %386 = vmatprep.subr.bf16.mxu0 %v385_v6  ;;  %406 = vset.pattern.permute.xlu1 %v449_v21  ;;  %v528_v37 = vshrl.u32 %v229_v36, 7  ;;  %v218_v41 = vld [vmem:[%s559_s4] sm:$0x7]  ;;  %s453_s4 = smov [#allocation2]  }
   0x7   :  { %407 = vset.pattern.permute.xlu0 %v450_v22  ;;  %221 = vperm.xlu1 %406, %v216_v20   ;;  %s327_s13 = sshll.u32 %s453_s4, 4  ;;  %s328_s13 = int_to_ptr.vmem [resolvable:$true] %s327_s13 }
   0x8   :  { %v231_v39 = vsub.s32 0, %v528_v37  ;;  %v247_v40 = vsub.s32 1, %v528_v37  ;;  %v265_v45 = vsub.s32 2, %v528_v37  ;;  %s425_s14 = scalar_lea.vmem %s328_s13, 256  ;;  %p430_p1 = scmp.lt.s32.totalorder %s328_s13, %s328_s13 }
   0x9   :  { %388 = vmatpush3.bf16.msra.mxu0 %v385_v6  ;;  %p426_p0 = scmp.ne.s32.totalorder %s328_s13, %s425_s14  ;;  %p431_p2 = scmp.lt.s32.totalorder %s425_s14, %s425_s14 }
   0xa   :  { %390 = vmatprep.subr.bf16.mxu0 %v389_v9  ;;  %v232_v43 = vrot.slane %v218_v41, %v231_v39  ;;  %v248_v44 = vrot.slane %v218_v41, %v247_v40  ;;  %v266_v49 = vrot.slane %v218_v41, %v265_v45 }
   0xb   :  { %226 = vperm.xlu1 %406, %v217_v23   ;;  %p432_p3 = por %p431_p2, %p430_p1 }
   0xd   :  { %392 = vmatpush3.bf16.msra.mxu0 %v389_v9  ;;  %p433_p4 = pnand %p432_p3, %p426_p0 }
   0xf   :  { %408 = vset.pattern.permute.xlu1 %v450_v22 }
  0x10   :  { %372 = vmatmul.mubr.msk.f32.vlgmr.msra.gmra.mrb[0].mxu0 %vm36_vm0, %v22_v10  ;;  %242 = vperm.xlu1 %408, %v217_v23  }
  0x14   :  { %409 = vset.pattern.permute.xlu1 %v451_v24 }
  0x15   :  { %256 = vperm.xlu1 %409, %v216_v20  }
  0x19   :  { %260 = vperm.xlu1 %409, %v217_v23  }
  0x86   :  { %v222_v34 = vpop.permute.xlu1 %221 }
  0x87   :  { %v233_v50 = vsub.f32 %v222_v34, %v232_v43 }
  0x89   :  { %v235_v56 = vmul.f32 %v233_v50, %v233_v50 }
  0x8a   :  { %v227_v35 = vpop.permute.xlu1 %226 }
  0x8b   :  { %v234_v47 = vsub.f32 %v227_v35, %v232_v43 }
  0x8d   :  { %v236_v53 = vmul.f32 %v234_v47, %v234_v47 }
  0x8f   :  { %v243_v38 = vpop.permute.xlu1 %242 }
  0x90   :  { %v250_v48 = vsub.f32 %v243_v38, %v248_v44  ;;  %v452_v38 = vmov 0.0  }
  0x92   :  { %v252_v54 = vmul.f32 %v250_v48, %v250_v48 }
  0x94   :  { %v257_v42 = vpop.permute.xlu1 %256  ;;  %v254_v59 = vadd.f32 %v252_v54, %v236_v53 }
  0x95   :  { %v267_v57 = vsub.f32 %v257_v42, %v266_v49 }
  0x97   :  { %v269_v61 = vmul.f32 %v267_v57, %v267_v57 }
  0x98   :  { %v261_v52 = vpop.permute.xlu1 %260 }
  0x99   :  { %v268_v55 = vsub.f32 %v261_v52, %v266_v49 }
  0x9b   :  { %v270_v60 = vmul.f32 %v268_v55, %v268_v55 }
  0x9d   :  { %v272_v63 = vadd.f32 %v270_v60, %v254_v59 }
  0x9f   :  { %v274_v1 = vsub.f32 0.0, %v272_v63 }
  0xa1   :  { %v277_v3 = vmul.f32 1.442695, %v274_v1 }
  0xe3   :  { %v373_v12 = vpop.f32.mrb[0].mxu0 }
  0xe4   :  { %v109_v13 = vpop.f32.mrb[1].mxu0  ;;  %v115_v14 = vadd.f32 %v373_v12, %v338_v11 }
  0xe5   :  { %v110_v15 = vadd.f32 %v338_v11, %v109_v13 }
  0xe6   :  { %v119_v18 = vmul.f32 %v115_v14, %v115_v14 }
  0xe7   :  { %v118_v16 = vmul.f32 %v110_v15, %v110_v15 }
  0xe8   :  { %v124_v19 = vsel %vm120_vm1, %v119_v18, 0.0 }
  0xe9   :  { %v121_v17 = vsel %vm120_vm1, %v118_v16, 0.0 }
  0xea   :  { %122 = vadd.xlane.f32.xlu0 %v121_v17 }
  0xee   :  { %125 = vadd.xlane.f32.xlu0 %v124_v19 }
 0x104   :  { %238 = vperm.xlu0 %407, %v216_v20  }
 0x108   :  { %410 = vset.pattern.permute.xlu0 %v451_v24 }
 0x177   :  { %v123_v25 = vpop.xlane.xlu0 %122 }
 0x178   :  { %v127_v26 = vadd.f32 1e-08, %v123_v25 }
 0x17a   :  { %411 = vrsqrt.f32 %v127_v26 }
 0x17b   :  { %v126_v27 = vpop.xlane.xlu0 %125 }
 0x17c   :  { %v128_v28 = vadd.f32 1e-08, %v126_v27 }
 0x17e   :  { %413 = vrsqrt.f32 %v128_v28 }
 0x17f   :  { %415 = vpow2.f32 %v277_v3 }
 0x183   :  { %v239_v46 = vpop.permute.xlu0 %238 }
 0x184   :  { %v412_v29 = vpop.eup %411  ;;  %v249_v51 = vsub.f32 %v239_v46, %v248_v44 }
 0x185   :  { %v131_v30 = vmul.f32 %v412_v29, %v110_v15  ;;  %v305_v29 = vadd.s32 8, %v528_v37 }
 0x186   :  { %v251_v58 = vmul.f32 %v249_v51, %v249_v51 }
 0x187   :  { %378 = vmatprep.mubr.msk.f32.mxu1 %vm120_vm1, %v131_v30 }
 0x188   :  { %v414_v31 = vpop.eup %413  ;;  %v253_v62 = vadd.f32 %v251_v58, %v235_v56 }
 0x189   :  { %v132_v32 = vmul.f32 %v414_v31, %v115_v14  ;;  %v416_v5 = vpop.eup %415 }
 0x18a   :  { %v271_v0 = vadd.f32 %v269_v61, %v253_v62  ;;  %v280_v10 = vmul.f32 10.0, %v416_v5 }
 0x18b   :  { %v393_v33 = vpack.c.bf16 %v132_v32, %v131_v30  ;;  %v307_v30 = vand.u32 127, %v229_v36 }
 0x18c   :  { %v273_v2 = vsub.f32 0.0, %v271_v0 }
 0x18d   :  { %395 = vmatprep.subr.msk.bf16.mxu1 %vm394_vm2, %v393_v33  ;;  %vm309_vm4 = vcmp.eq.s32.totalorder %v305_v29, %v307_v30  ;;  %vm308_vm5 = vcmp.eq.s32.totalorder %v528_v37, %v307_v30 }
 0x18e   :  { %398 = vmatpush3.bf16.xpose.msk.msra.mxu1 %vm394_vm2, %v393_v33  ;;  %v275_v4 = vmul.f32 1.442695, %v273_v2  ;;  %v346_v39 = vsel %vm309_vm4, 1.0, %v452_v38  ;;  %v345_v40 = vsel %vm308_vm5, 1.0, %v452_v38 }
 0x190   :  { %417 = vpow2.f32 %v275_v4 }
 0x195   :  { %379 = vmatmul.mubr.msk.f32.vlgmr.msra.gmra.mrb[0].mxu1 %vm120_vm1, %v132_v32 }
 0x19a   :  { %v418_v6 = vpop.eup %417 }
 0x19b   :  { %v279_v12 = vmul.f32 10.0, %v418_v6 }
 0x268   :  { %v380_v7 = vpop.f32.mrb[0].mxu1 }
 0x269   :  { %v215_v8 = vmax.f32 %v380_v7, 0.0  ;;  %v205_v9 = vpop.f32.mrb[1].mxu1 }
 0x26a   :  { %v214_v11 = vmax.f32 %v205_v9, 0.0 }
 0x26b   :  { %v282_v13 = vadd.f32 %v280_v10, %v215_v8 }
 0x26c   :  { %v281_v14 = vadd.f32 %v279_v12, %v214_v11 }
 0x26d   :  { %v287_v15 = vsel %vm283_vm3, %v282_v13, 0.0 }
 0x26e   :  { %288 = vadd.xlane.f32.xlu0 %v287_v15  ;;  %v284_v16 = vsel %vm283_vm3, %v281_v14, 0.0 }
 0x26f   :  { %285 = vadd.xlane.f32.xlu1 %v284_v16  ;;  %v294_v17 = vadd.f32 %v287_v15, %v284_v16 }
 0x271   :  { %v295_v18 = vrot.slane %v294_v17, 4 }
 0x273   :  { %v296_v19 = vadd.f32 %v295_v18, %v294_v17 }
 0x275   :  { %v297_v20 = vrot.slane %v296_v19, 2 }
 0x277   :  { %v298_v21 = vadd.f32 %v297_v20, %v296_v19 }
 0x279   :  { %v299_v22 = vrot.slane %v298_v21, 1 }
 0x27b   :  { %v300_v23 = vadd.f32 %v299_v22, %v298_v21 }
 0x27d   :  { %v301_v25 = vadd.f32 1e-08, %v300_v23 }
 0x2fb   :  { %v289_v24 = vpop.xlane.xlu0 %288 }
 0x2fc   :  { %v291_v26 = vadd.f32 1e-08, %v289_v24  ;;  %v286_v27 = vpop.xlane.xlu1 %285 }
 0x2fd   :  { %v290_v28 = vadd.f32 1e-08, %v286_v27 }
 0x2fe   :  { %419 = vrsqrt.f32 %v291_v26 }
 0x2ff   :  { %421 = vrsqrt.f32 %v290_v28 }
 0x300   :  { %423 = vrsqrt.f32 %v301_v25 }
 0x308   :  { %v420_v31 = vpop.eup %419 }
 0x309   :  { %v422_v32 = vpop.eup %421  ;;  %v315_v33 = vmul.f32 %v420_v31, %v282_v13 }
 0x30a   :  { %v424_v34 = vpop.eup %423  ;;  %v314_v35 = vmul.f32 %v422_v32, %v281_v14 }
 0x30b   :  { %v317_v41 = vmul.f32 %v424_v34, %v315_v33 }
 0x30c   :  { %v316_v42 = vmul.f32 %v424_v34, %v314_v35 }
 0x30d   :  { %v319_v43 = vsub.f32 %v346_v39, %v317_v41 }
 0x30e   :  { %v318_v44 = vsub.f32 %v345_v40, %v316_v42 }
 0x30f   :  { %321 = vst.msk [vmem:[#allocation2 + $0x8] sm:$0xff] %vm283_vm3, %v319_v43 }
 0x310   :  { %320 = vst.msk [vmem:[#allocation2] sm:$0xff] %vm283_vm3, %v318_v44 }
 0x311   :  { %436 = shalt.err (!%p433_p4)
}
 0x312   :  { %s437_s17 = scalar_lea.hbm %s560_s5, 256 }
 0x313   :  { %p438_p5 = scmp.ne.s32.totalorder %s560_s5, %s437_s17  ;;  %p441_p6 = scmp.lt.u32.totalorder %s437_s17, %s560_s5 }
 0x315   :  { %p443_p7 = pnand %p441_p6, %p438_p5 }
 0x317   :  { %446 = shalt.err (!%p443_p7)
}
 0x318   :  { %s454_s22 = smov 128   ;;  %s455_s23 = smov 8  }
 0x319   :  { %333 = dma.vmem_to_hbm [thread:$0]  %s328_s13, 256, %s560_s5, [#allocation3], %s454_s22, %s454_s22, %s455_s23  }
 0x31a   :  { %447 = dma.done.wait [#allocation3], 256  }
 0x31b   :  { %448 = vsyncadd [#allocation3], 4294967040 }
 0x31c   :  { %337 = vsyncpa [#allocation3], 1 }

</bundles_post_ra>
